<compile_context>
chip_gen: v7x
topology: tpu7x:2x2x1
jax: 0.10.0
libtpu: 0.0.40
codegen_flags: <defaults>
</compile_context>

<pallas_src>
import jax
import jax.numpy as jnp
from jax.experimental import pallas as pl
from jax.experimental.pallas import tpu as pltpu

H = 128   # Placeholder 'H'
W = 128   # Placeholder 'W'

# Batches at or below this take the grid-free single-block path (no pipeline
# machinery for what is at most a ~2 MiB f32 input slab).
_SMALL_B_CUTOFF = 2048

# Largest auto-chosen row tile: f32 double-buffered x+out at 4096 rows is
# ~8.6 MiB, comfortably under v5e's 16 MiB scoped-VMEM default (and trivial
# on v6e/v7x).
_TM_MAX = 4096


def _dense_kernel(x_ref, w_ref, o_ref):
    # Hot path: one MXU matmul per (TM, 128) x-tile, f32 accumulation.
    acc = jnp.dot(x_ref[...], w_ref[...], preferred_element_type=jnp.float32)
    # No-op (elided at trace time) when o_ref is f32; correct downcast point
    # for a bf16 output after f32 accumulation.
    o_ref[...] = acc.astype(o_ref.dtype)


def _cost_estimate(B: int, x_dtype, w_dtype, out_dtype) -> pl.CostEstimate:
    xb = B * H * jnp.dtype(x_dtype).itemsize
    wb = H * W * jnp.dtype(w_dtype).itemsize
    ob = B * W * jnp.dtype(out_dtype).itemsize
    return pl.CostEstimate(
        flops=2 * B * H * W, transcendentals=0, bytes_accessed=xb + wb + ob
    )


def _small_forward(x: jax.Array, w: jax.Array) -> jax.Array:
    """Single-block, grid-free call for small/mid batches (no pipeline overhead)."""
    B = x.shape[0]
    return pl.pallas_call(
        _dense_kernel,
        out_shape=jax.ShapeDtypeStruct((B, W), x.dtype),
        in_specs=[
            pl.BlockSpec((B, H), lambda: (0, 0)),
            pl.BlockSpec((H, W), lambda: (0, 0)),
        ],
        out_specs=pl.BlockSpec((B, W), lambda: (0, 0)),
        cost_estimate=_cost_estimate(B, x.dtype, w.dtype, x.dtype),
    )(x, w)


def _tiled_forward(x: jax.Array, w: jax.Array, tm: int) -> jax.Array:
    """Batch-tiled, pipelined path; weight stays VMEM-resident across steps."""
    B = x.shape[0]
    itemsize = jnp.dtype(x.dtype).itemsize
    # Double-buffered x + out tiles plus the resident 64 KiB weight.
    vmem_need = 2 * tm * (H + W) * itemsize + H * W * jnp.dtype(w.dtype).itemsize
    # Only override the scoped-VMEM limit when a (user-supplied) TM would not
    # fit the conservative v5e default of 16 MiB; leave defaults otherwise.
    vmem_limit = None
    if vmem_need > (12 << 20):
        vmem_limit = min(2 * vmem_need, 100 << 20)
    return pl.pallas_call(
        _dense_kernel,
        out_shape=jax.ShapeDtypeStruct((B, W), x.dtype),
        grid_spec=pltpu.PrefetchScalarGridSpec(
            num_scalar_prefetch=0,
            grid=(pl.cdiv(B, tm),),
            in_specs=[
                pl.BlockSpec((tm, H), lambda i: (i, 0)),
                # Constant block index -> weight fetched once, kept resident.
                pl.BlockSpec((H, W), lambda i: (0, 0)),
            ],
            out_specs=pl.BlockSpec((tm, W), lambda i: (i, 0)),
        ),
        compiler_params=pltpu.CompilerParams(
            # Batch rows are independent: let v7x shard steps across both TCs.
            dimension_semantics=("parallel",),
            vmem_limit_bytes=vmem_limit,
        ),
        cost_estimate=_cost_estimate(B, x.dtype, w.dtype, x.dtype),
    )(x, w)


def _choose_tm(B: int, dtype) -> int:
    """Largest tile <= _TM_MAX giving an even number of grid steps (>= 2)."""
    sub = 16 if dtype == jnp.bfloat16 else 8
    steps = 2
    while pl.cdiv(B, steps) > _TM_MAX:
        steps += 2
    tm = pl.cdiv(B, steps)
    tm = max(sub, ((tm + sub - 1) // sub) * sub)   # round up to sublane tile
    return min(tm, _TM_MAX)


def model_forward(x: jax.Array, w: jax.Array, *, tm: int | None = None) -> jax.Array:
    """Pallas equivalent of Model.forward: y = x @ W."""
    B = x.shape[0]
    if tm is None:
        if B <= _SMALL_B_CUTOFF:
            return _small_forward(x, w)
        tm = _choose_tm(B, x.dtype)
    return _tiled_forward(x, w, tm)


if __name__ == "__main__":
    key = jax.random.PRNGKey(0)
    kx, kw = jax.random.split(key)

    # Deterministic parameter init (synthetic weights, no checkpoint load).
    w = jax.random.normal(kw, (H, W), dtype=jnp.float32) * 0.02

    # Small demo shape -> grid-free single-block path.
    B_small = 8
    x_small = jax.random.normal(kx, (B_small, H), dtype=jnp.float32)
    y_small = model_forward(x_small, w)
    jax.block_until_ready(y_small)
    ref_small = x_small @ w
    assert y_small.shape == (B_small, W)
    assert jnp.allclose(y_small, ref_small, atol=1e-4, rtol=1e-4)

    # Larger batch, explicit tm=1024 -> tiled path with 2 grid steps
    # (one per v7x TensorCore; harmless on v5e/v6e).
    B_big = 2048
    x_big = jax.random.normal(kx, (B_big, H), dtype=jnp.float32)
    y_big = model_forward(x_big, w, tm=1024)
    jax.block_until_ready(y_big)
    ref_big = x_big @ w
    assert y_big.shape == (B_big, W)
    assert jnp.allclose(y_big, ref_big, atol=1e-4, rtol=1e-4)

    # Default heuristic on a batch above the cutoff -> tm=4096, even grid.
    B_huge = 8192
    x_huge = jax.random.normal(kx, (B_huge, H), dtype=jnp.float32)
    y_huge = model_forward(x_huge, w)
    jax.block_until_ready(y_huge)
    ref_huge = x_huge @ w
    assert y_huge.shape == (B_huge, W)
    assert jnp.allclose(y_huge, ref_huge, atol=1e-4, rtol=1e-4)

    print("KERNEL_OK")
</pallas_src>

<mosaic_0001>
module attributes {stable_mosaic.version = 11 : i64} {
  func.func @_dense_kernel(%arg0: memref<8x128xf32, #tpu.memory_space<vmem>>, %arg1: memref<128x128xf32, #tpu.memory_space<vmem>>, %arg2: memref<8x128xf32, #tpu.memory_space<vmem>>) attributes {dimension_semantics = [], scalar_prefetch = 0 : i64, scratch_operands = 0 : i64, tpu.core_type = #tpu.core_type<tc>} {
    %c0 = arith.constant 0 : index
    %c0_0 = arith.constant 0 : index
    %0 = vector.load %arg0[%c0, %c0_0] : memref<8x128xf32, #tpu.memory_space<vmem>>, vector<8x128xf32>
    %c0_1 = arith.constant 0 : index
    %c0_2 = arith.constant 0 : index
    %1 = vector.load %arg1[%c0_1, %c0_2] : memref<128x128xf32, #tpu.memory_space<vmem>>, vector<128x128xf32>
    %cst = arith.constant dense<0.000000e+00> : vector<8x128xf32>
    %2 = tpu.matmul %0, %1, %cst {dimension_numbers = #tpu.dot_dimension_numbers<[1], [0], [0], [1], [0, 0, 1, 1], [], []>} : vector<8x128xf32>, vector<128x128xf32>, vector<8x128xf32> -> vector<8x128xf32>
    %c0_3 = arith.constant 0 : index
    %c0_4 = arith.constant 0 : index
    %3 = vector.load %arg2[%c0_3, %c0_4] : memref<8x128xf32, #tpu.memory_space<vmem>>, vector<8x128xf32>
    tpu.vector_store %arg2[%c0_3, %c0_4], %2 {strides = array<i32>} : memref<8x128xf32, #tpu.memory_space<vmem>>, vector<8x128xf32>,
    return
  }
}

</mosaic_0001>

<bundles_post_ra>
// kernel: tpu_custom_call.1
= control target key start
LH: loop header
LB: loop body
LE: loop exit
PB: predicated region body
PF: predicated region fallthrough
CT: control target
= control target key end

     0   :  { %7 = vsyncpa [#allocation3], 0  ;;  %s364_s0 = inlined_call_operand.hbm [shape: f32[8,128], index: 0, kind: input, shape index: {}]   ;;  %s365_s1 = inlined_call_operand.hbm [shape: f32[128,128], index: 1, kind: input, shape index: {}]   ;;  %s366_s2 = inlined_call_operand.hbm [shape: f32[8,128], index: 2, kind: output, shape index: {}]  }
   0x1   :  { %8 = vsyncpa [#allocation6], 0 }
   0x2   :  { %9 = vsyncpa [#allocation4], 0  ;;  %s298_s9 = smov [#allocation2]   ;;  %s299_s11 = smov [#allocation5]  }
   0x3   :  { %s16_s10 = sshll.u32 %s298_s9, 4  ;;  %s25_s12 = sshll.u32 %s299_s11, 4  ;;  %s17_s10 = int_to_ptr.vmem [resolvable:$true] %s16_s10  ;;  %s321_s12 = int_to_ptr.vmem [resolvable:$true] %s25_s12 }
   0x4   :  { %s226_s15 = scalar_lea.hbm %s364_s0, 128 }
   0x5   :  { %p227_p0 = scmp.ne.s32.totalorder %s364_s0, %s226_s15  ;;  %p230_p1 = scmp.lt.u32.totalorder %s226_s15, %s364_s0 }
   0x7   :  { %p232_p2 = pnand %p230_p1, %p227_p0 }
   0x9   :  { %235 = shalt.err (!%p232_p2)
}
   0xa   :  { %s236_s20 = scalar_lea.vmem %s17_s10, 128  ;;  %p241_p4 = scmp.lt.s32.totalorder %s17_s10, %s17_s10 }
   0xb   :  { %p237_p3 = scmp.ne.s32.totalorder %s17_s10, %s236_s20  ;;  %p242_p5 = scmp.lt.s32.totalorder %s236_s20, %s236_s20 }
   0xd   :  { %p243_p6 = por %p242_p5, %p241_p4 }
   0xf   :  { %p244_p7 = pnand %p243_p6, %p237_p3 }
  0x11   :  { %247 = shalt.err (!%p244_p7)
}
  0x12   :  { %19 = dma.hbm_to_vmem [thread:$0]  %s364_s0, 128, %s17_s10, [#allocation3]  }
  0x13   :  { %s248_s25 = scalar_lea.hbm %s365_s1, 2048 }
  0x14   :  { %p249_p8 = scmp.ne.s32.totalorder %s365_s1, %s248_s25  ;;  %p252_p9 = scmp.lt.u32.totalorder %s248_s25, %s365_s1 }
  0x16   :  { %p254_p10 = pnand %p252_p9, %p249_p8 }
  0x18   :  { %257 = shalt.err (!%p254_p10)
}
  0x19   :  { %s258_s30 = scalar_lea.vmem %s321_s12, 2048  ;;  %p263_p12 = scmp.lt.s32.totalorder %s321_s12, %s321_s12 }
  0x1a   :  { %p259_p11 = scmp.ne.s32.totalorder %s321_s12, %s258_s30  ;;  %p264_p13 = scmp.lt.s32.totalorder %s258_s30, %s258_s30 }
  0x1c   :  { %p265_p0 = por %p264_p13, %p263_p12 }
  0x1e   :  { %p266_p1 = pnand %p265_p0, %p259_p11 }
  0x20   :  { %269 = shalt.err (!%p266_p1)
}
  0x21   :  { %s300_s0 = smov 128   ;;  %s301_s3 = smov 8  }
  0x22   :  { %31 = dma.hbm_to_vmem [thread:$0]  %s365_s1, 2048, %s321_s12, [#allocation6], %s300_s0, %s300_s0, %s301_s3  }
  0x23   :  { %292 = dma.done.wait [#allocation3], 128  }
  0x24   :  { %293 = vsyncadd [#allocation3], 4294967168 }
  0x25   :  { %294 = dma.done.wait [#allocation6], 2048  }
  0x26   :  { %295 = vsyncadd [#allocation6], 4294965248  ;;  %v302_v0 = vmov 0.0|0.0   ;;  %vm303_vm0 = vmmov 0   ;;  %v304_v1 = vmov 0.0   ;;  %v39_v2 = vld [vmem:[#allocation5] sm:$0xff] }
  0x27   :  { %194 = vmatprep.subr.bf16.mxu0 %v302_v0  ;;  %191 = vmatprep.mubr.msk.f32.mxu0 %vm303_vm0, %v304_v1  ;;  %v40_v3 = vld [vmem:[#allocation5 + $0x8] sm:$0xff]  ;;  %v41_v4 = vld [vmem:[#allocation5 + $0x10] sm:$0xff]  ;;  %v42_v6 = vld [vmem:[#allocation5 + $0x18] sm:$0xff]  ;;  %s305_s1 = smov [#allocation7]  }
  0x28   :  { %v195_v5 = vpack.c.bf16 %v40_v3, %v39_v2  ;;  %v198_v7 = vpack.c.bf16 %v42_v6, %v41_v4  ;;  %v43_v8 = vld [vmem:[#allocation5 + $0x20] sm:$0xff]  ;;  %v44_v9 = vld [vmem:[#allocation5 + $0x28] sm:$0xff]  ;;  %v45_v11 = vld [vmem:[#allocation5 + $0x30] sm:$0xff]  ;;  %s132_s6 = sshll.u32 %s305_s1, 4  ;;  %s133_s6 = int_to_ptr.vmem [resolvable:$true] %s132_s6 }
  0x29   :  { %v201_v10 = vpack.c.bf16 %v44_v9, %v43_v8  ;;  %v46_v12 = vld [vmem:[#allocation5 + $0x38] sm:$0xff]  ;;  %v47_v14 = vld [vmem:[#allocation5 + $0x40] sm:$0xff]  ;;  %v48_v15 = vld [vmem:[#allocation5 + $0x48] sm:$0xff]  ;;  %s270_s7 = scalar_lea.vmem %s133_s6, 128  ;;  %p275_p3 = scmp.lt.s32.totalorder %s133_s6, %s133_s6 }
  0x2a   :  { %196 = vmatpush3.bf16.msra.mxu0 %v195_v5  ;;  %v204_v13 = vpack.c.bf16 %v46_v12, %v45_v11  ;;  %v207_v16 = vpack.c.bf16 %v48_v15, %v47_v14  ;;  %v49_v17 = vld [vmem:[#allocation5 + $0x50] sm:$0xff]  ;;  %v50_v18 = vld [vmem:[#allocation5 + $0x58] sm:$0xff]  ;;  %v51_v20 = vld [vmem:[#allocation5 + $0x60] sm:$0xff]  ;;  %p271_p2 = scmp.ne.s32.totalorder %s133_s6, %s270_s7  ;;  %p276_p4 = scmp.lt.s32.totalorder %s270_s7, %s270_s7 }
  0x2b   :  { %197 = vmatprep.subr.bf16.mxu0 %v302_v0  ;;  %v210_v19 = vpack.c.bf16 %v50_v18, %v49_v17  ;;  %v52_v21 = vld [vmem:[#allocation5 + $0x68] sm:$0xff]  ;;  %v53_v23 = vld [vmem:[#allocation5 + $0x70] sm:$0xff]  ;;  %v54_v24 = vld [vmem:[#allocation5 + $0x78] sm:$0xff] }
  0x2c   :  { %v213_v22 = vpack.c.bf16 %v52_v21, %v51_v20  ;;  %v216_v25 = vpack.c.bf16 %v54_v24, %v53_v23  ;;  %v38_v26 = vld [vmem:[#allocation2] sm:$0xff]  ;;  %p277_p5 = por %p276_p4, %p275_p3 }
  0x2e   :  { %199 = vmatpush3.bf16.msra.mxu0 %v198_v7  ;;  %p278_p6 = pnand %p277_p5, %p271_p2 }
  0x2f   :  { %200 = vmatprep.subr.bf16.mxu0 %v302_v0 }
  0x32   :  { %202 = vmatpush3.bf16.msra.mxu0 %v201_v10 }
  0x33   :  { %203 = vmatprep.subr.bf16.mxu0 %v302_v0 }
  0x36   :  { %205 = vmatpush3.bf16.msra.mxu0 %v204_v13 }
  0x37   :  { %206 = vmatprep.subr.bf16.mxu0 %v302_v0 }
  0x3a   :  { %208 = vmatpush3.bf16.msra.mxu0 %v207_v16 }
  0x3b   :  { %209 = vmatprep.subr.bf16.mxu0 %v302_v0 }
  0x3e   :  { %211 = vmatpush3.bf16.msra.mxu0 %v210_v19 }
  0x3f   :  { %212 = vmatprep.subr.bf16.mxu0 %v302_v0 }
  0x42   :  { %214 = vmatpush3.bf16.msra.mxu0 %v213_v22 }
  0x43   :  { %215 = vmatprep.subr.bf16.mxu0 %v302_v0 }
  0x46   :  { %217 = vmatpush3.bf16.msra.mxu0 %v216_v25 }
  0x49   :  { %192 = vmatmul.mubr.f32.vlgmr.msra.gmra.mrb[0].mxu0 %v38_v26 }
 0x11c   :  { %v121_v27 = vpop.f32.mrb[0].mxu0 }
 0x11d   :  { %125 = vst [vmem:[#allocation7] sm:$0xff] %v121_v27  ;;  %v193_v28 = vpop.f32.mrb[1].mxu0 }
 0x11e   :  { %281 = shalt.err (!%p278_p6)
}
 0x11f   :  { %s282_s10 = scalar_lea.hbm %s366_s2, 128 }
 0x120   :  { %p283_p7 = scmp.ne.s32.totalorder %s366_s2, %s282_s10  ;;  %p286_p8 = scmp.lt.u32.totalorder %s282_s10, %s366_s2 }
 0x122   :  { %p288_p9 = pnand %p286_p8, %p283_p7 }
 0x124   :  { %291 = shalt.err (!%p288_p9)
}
 0x125   :  { %135 = dma.vmem_to_hbm [thread:$0]  %s133_s6, 128, %s366_s2, [#allocation4]  }
 0x126   :  { %296 = dma.done.wait [#allocation4], 128  }
 0x127   :  { %297 = vsyncadd [#allocation4], 4294967168 }
 0x128   :  { %139 = vsyncpa [#allocation3], 1 }
 0x129   :  { %140 = vsyncpa [#allocation6], 1 }
 0x12a   :  { %141 = vsyncpa [#allocation4], 1 }

</bundles_post_ra>
